<compile_context>
chip_gen: v7x
topology: tpu7x:2x2x1
jax: 0.10.0
libtpu: 0.0.40
codegen_flags: <defaults>
</compile_context>

<pallas_src>
import functools
import math

import jax
import jax.numpy as jnp
from jax import lax
from jax.experimental import pallas as pl
from jax.experimental.pallas import tpu as pltpu


def _essattn_kernel(x_ref, w3_ref, b3_ref, wln_ref, bln_ref, out_ref,
                    kv_acc, ss_acc, *, seq_len):
    # x_ref:   (TB, TN, C)   activations (f32 or bf16)
    # w3_ref:  (3, C, C)     bf16, pre-transposed slabs: y_i = x @ w3[i]
    # b3_ref:  (3, 1, C)     f32 biases (q, k, v)
    # wln_ref: (C, C)        bf16, pre-transposed
    # bln_ref: (1, C)        f32
    # out_ref: (TB, TN, C)
    # kv_acc:  (TB, C, C)    f32 scratch, resident across (phase, n) steps
    # ss_acc:  (TB, 1, C)    f32 scratch: sum over sequence of k2_row^2
    TB, TN, C = x_ref.shape
    phase = pl.program_id(1)
    nidx = pl.program_id(2)

    x2d = x_ref[...].reshape(TB * TN, C).astype(jnp.bfloat16)

    @pl.when(jnp.logical_and(phase == 0, nidx == 0))
    def _init():
        kv_acc[...] = jnp.zeros_like(kv_acc)
        ss_acc[...] = jnp.zeros_like(ss_acc)

    @pl.when(phase == 0)
    def _accumulate_kv():
        k = jnp.dot(x2d, w3_ref[1], preferred_element_type=jnp.float32)
        k = k + b3_ref[1]
        v = jnp.dot(x2d, w3_ref[2], preferred_element_type=jnp.float32)
        v = v + b3_ref[2]
        k = k - jnp.mean(k, axis=-1, keepdims=True)
        k2 = k * k
        # Row-wise scale does NOT cancel here (the following normalization is
        # over the sequence axis), so keep it; EUP approx reciprocal.
        k2 = k2 * pl.reciprocal(jnp.sum(k2, axis=-1, keepdims=True) + 1e-7,
                                approx=True)
        k2b = k2.reshape(TB, TN, C)
        vb = v.reshape(TB, TN, C)
        ss_acc[...] += jnp.sum(k2b * k2b, axis=1, keepdims=True)
        # kv[b, c, d] += sum_n k2[b, n, c] * v[b, n, d]   (bf16 in, f32 acc)
        kv_acc[...] += lax.dot_general(
            k2b.astype(jnp.bfloat16), vb.astype(jnp.bfloat16),
            dimension_numbers=(((1,), (1,)), ((0,), (0,))),
            preferred_element_type=jnp.float32)

    @pl.when(phase == 1)
    def _produce_output():
        q = jnp.dot(x2d, w3_ref[0], preferred_element_type=jnp.float32)
        q = q + b3_ref[0]
        v = jnp.dot(x2d, w3_ref[2], preferred_element_type=jnp.float32)
        v = v + b3_ref[2]
        q = q - jnp.mean(q, axis=-1, keepdims=True)
        q2 = q * q
        # The reference's q2/(sum(q2)+1e-7) per-row scale cancels exactly in
        # this per-row L2 normalization, so it is omitted.
        q2 = q2 * lax.rsqrt(
            jnp.maximum(jnp.sum(q2 * q2, axis=-1, keepdims=True), 1e-24))
        q2b = q2.reshape(TB, TN, C)
        vb = v.reshape(TB, TN, C)

        # Sequence-axis L2 norm of k2 (per channel c) and the 1/sqrt(N) factor
        # folded into one per-channel scale, applied to q2 (lane broadcast —
        # avoids transposing the scale to apply it to kv's sublane axis):
        #   scale_c = 1 / (max(||k2[:, c]||_2, 1e-12) * sqrt(N))
        scale = lax.rsqrt(jnp.maximum(ss_acc[...], 1e-24) * seq_len)
        q2b = q2b * scale                                     # (TB,TN,C)*(TB,1,C)

        # t2[b, n, d] = sum_c q2[b, n, c] * kv[b, c, d]
        t2 = lax.dot_general(
            q2b.astype(jnp.bfloat16), kv_acc[...].astype(jnp.bfloat16),
            dimension_numbers=(((2,), (1,)), ((0,), (0,))),
            preferred_element_type=jnp.float32)

        attn = vb + t2                                        # (TB, TN, C) f32

        out = jnp.dot(attn.reshape(TB * TN, C).astype(jnp.bfloat16),
                      wln_ref[...], preferred_element_type=jnp.float32)
        out = out + bln_ref[...]
        out_ref[...] = out.reshape(TB, TN, C).astype(out_ref.dtype)


def essattn_prepare_params(wqkv, bqkv, wln, bln):
    """One-time weight prep (hoisted out of the per-forward path).

    wqkv: (3C, C) torch Linear weight; bqkv: (3C,); wln: (C, C); bln: (C,).
    Returns (w3, b3, wln_t, bln_2d) with MXU-friendly layouts/dtypes.
    """
    C = wln.shape[0]
    w3 = jnp.transpose(wqkv.reshape(3, C, C), (0, 2, 1)).astype(jnp.bfloat16)
    b3 = bqkv.reshape(3, 1, C).astype(jnp.float32)
    wln_t = jnp.transpose(wln).astype(jnp.bfloat16)
    bln_2d = bln.reshape(1, C).astype(jnp.float32)
    return w3, b3, wln_t, bln_2d


def _largest_divisor_leq(n, cap):
    cap = max(1, min(n, cap))
    for d in range(cap, 0, -1):
        if n % d == 0:
            return d
    return 1


def _pick_seq_tile(N, C, itemsize, budget_bytes):
    """Largest multiple-of-8 divisor of N whose (tn, C) tile fits the budget
    (or N itself if the whole sequence fits / no such divisor exists)."""
    rows_cap = max(8, budget_bytes // max(1, C * itemsize))
    if N <= rows_cap:
        return N
    best = None
    d = 8
    while d <= rows_cap and d < N:
        if N % d == 0:
            best = d
        d += 8
    return best if best is not None else N


def _vmem_limit_bytes():
    # Raise v5e's 16 MiB default scoped limit; stay inside v7x's 64 MiB VMEM.
    try:
        cap = int(pltpu.get_tpu_info().vmem_capacity_bytes)
    except Exception:
        cap = 64 << 20
    return max(32 << 20, min(cap * 3 // 4, 96 << 20))


def essattn_pallas(x, params, *, target_rows=512, x_block_bytes=2 << 20):
    """x: (B, N, C); params: output of essattn_prepare_params."""
    w3, b3, wln_t, bln_2d = params
    B, N, C = x.shape
    itemsize = jnp.dtype(x.dtype).itemsize

    # ---- tiles: divisors of N / B (no padding, no ragged tiles), capped so
    # each x block stays ~<= x_block_bytes and the kv scratch stays small.
    tn = _pick_seq_tile(N, C, itemsize, x_block_bytes)
    tb_cap = min(max(1, target_rows // tn),
                 max(1, x_block_bytes // max(1, tn * C * itemsize)),
                 max(1, (8 << 20) // max(1, C * C * 4)))
    if B >= 2:
        tb_cap = min(tb_cap, max(1, B // 2))   # keep >= 2 parallel steps
    tb = _largest_divisor_leq(B, tb_cap)
    grid_b = B // tb
    grid_n = N // tn
    grid = (grid_b, 2, grid_n)                 # (batch, phase, seq)

    flops = 14 * B * N * C * C                 # q/k/v(+v recompute), kv, t2, ln
    transcendentals = 3 * B * N + B * C * grid_n
    bytes_accessed = (B * N * C * itemsize * ((2 if grid_n > 1 else 1) + 1)
                      + (w3.size + wln_t.size) * 2
                      + (b3.size + bln_2d.size) * 4)

    return pl.pallas_call(
        functools.partial(_essattn_kernel, seq_len=float(N)),
        out_shape=jax.ShapeDtypeStruct((B, N, C), x.dtype),
        grid_spec=pltpu.PrefetchScalarGridSpec(
            num_scalar_prefetch=0,
            grid=grid,
            in_specs=[
                pl.BlockSpec((tb, tn, C), lambda b, p, n: (b, n, 0)),
                pl.BlockSpec((3, C, C), lambda b, p, n: (0, 0, 0)),
                pl.BlockSpec((3, 1, C), lambda b, p, n: (0, 0, 0)),
                pl.BlockSpec((C, C), lambda b, p, n: (0, 0)),
                pl.BlockSpec((1, C), lambda b, p, n: (0, 0)),
            ],
            # Phase 0 never writes the output: map all its steps to block
            # (b, 0) so the resident buffer is only flushed after phase 1
            # fully rewrites it (no junk writebacks, no extra HBM traffic).
            out_specs=pl.BlockSpec((tb, tn, C), lambda b, p, n: (b, n * p, 0)),
            scratch_shapes=[
                pltpu.VMEM((tb, C, C), jnp.float32),   # kv accumulator
                pltpu.VMEM((tb, 1, C), jnp.float32),   # sum(k2^2) over seq
            ]),
        compiler_params=pltpu.CompilerParams(
            dimension_semantics=("parallel", "arbitrary", "arbitrary"),
            vmem_limit_bytes=_vmem_limit_bytes()),
        cost_estimate=pl.CostEstimate(
            flops=flops,
            transcendentals=transcendentals,
            bytes_accessed=bytes_accessed),
    )(x, w3, b3, wln_t, bln_2d)


def essattn_ref(x, wqkv, bqkv, wln, bln):
    """Pure-JAX f32 reference mirroring the PyTorch forward exactly."""
    B, N, C = x.shape
    qkv = jnp.einsum("bnc,dc->bnd", x, wqkv) + bqkv
    q, k, v = qkv[..., :C], qkv[..., C:2 * C], qkv[..., 2 * C:]
    q = q - jnp.mean(q, axis=2, keepdims=True)
    k = k - jnp.mean(k, axis=2, keepdims=True)
    q2 = q ** 2
    k2 = k ** 2
    q2s = jnp.sum(q2, axis=2, keepdims=True)
    k2s = jnp.sum(k2, axis=2, keepdims=True)
    t1 = v
    k2 = k2 / (k2s + 1e-7)
    k2 = k2 / jnp.maximum(
        jnp.sqrt(jnp.sum(k2 * k2, axis=-2, keepdims=True)), 1e-12)
    q2 = q2 / (q2s + 1e-7)
    q2 = q2 / jnp.maximum(
        jnp.sqrt(jnp.sum(q2 * q2, axis=-1, keepdims=True)), 1e-12)
    t2 = jnp.einsum("bnc,bcd->bnd", q2,
                    jnp.einsum("bnc,bnd->bcd", k2, v)) / math.sqrt(N)
    attn = t1 + t2
    return jnp.einsum("bnc,dc->bnd", attn, wln) + bln


if __name__ == "__main__":
    B, N, C = 2, 8, 32

    key = jax.random.PRNGKey(0)
    kx, k1, k2_, k3, k4 = jax.random.split(key, 5)

    x = jax.random.normal(kx, (B, N, C), dtype=jnp.float32)

    # Deterministic parameter init (PyTorch Linear shapes: W (out, in), b (out,))
    bound = 1.0 / math.sqrt(C)
    wqkv = jax.random.uniform(k1, (3 * C, C), jnp.float32, -bound, bound)
    bqkv = jax.random.uniform(k2_, (3 * C,), jnp.float32, -bound, bound)
    wln = jax.random.uniform(k3, (C, C), jnp.float32, -bound, bound)
    bln = jax.random.uniform(k4, (C,), jnp.float32, -bound, bound)

    # One-time weight prep (transpose + bf16 cast) hoisted off the fwd path.
    params = jax.block_until_ready(essattn_prepare_params(wqkv, bqkv, wln, bln))

    out = jax.block_until_ready(essattn_pallas(x, params))
    ref = jax.block_until_ready(essattn_ref(x, wqkv, bqkv, wln, bln))

    assert out.shape == (B, N, C)
    assert bool(jnp.all(jnp.isfinite(out)))
    # Tolerance loosened vs the f32 reference because the kernel feeds the MXU
    # in bf16 (with f32 accumulation).
    assert jnp.allclose(out, ref, atol=5e-2, rtol=5e-2), (
        float(jnp.max(jnp.abs(out - ref))))
    print("KERNEL_OK")
</pallas_src>

<mosaic_0001>
module attributes {stable_mosaic.version = 11 : i64} {
  func.func @_essattn_kernel(%arg0: i32, %arg1: i32, %arg2: i32, %arg3: memref<1x8x32xf32, #tpu.memory_space<vmem>>, %arg4: memref<3x32x32xbf16, #tpu.memory_space<vmem>>, %arg5: memref<3x1x32xf32, #tpu.memory_space<vmem>>, %arg6: memref<32x32xbf16, #tpu.memory_space<vmem>>, %arg7: memref<1x32xf32, #tpu.memory_space<vmem>>, %arg8: memref<1x8x32xf32, #tpu.memory_space<vmem>>, %arg9: memref<1x32x32xf32, #tpu.memory_space<vmem>>, %arg10: memref<1x1x32xf32, #tpu.memory_space<vmem>>) attributes {dimension_semantics = [#tpu.dimension_semantics<parallel>, #tpu.dimension_semantics<arbitrary>, #tpu.dimension_semantics<arbitrary>], iteration_bounds = array<i64: 2, 2, 1>, scalar_prefetch = 0 : i64, scratch_operands = 2 : i64, tpu.core_type = #tpu.core_type<tc>, window_params = [{transform_indices = @transform_0, window_bounds = array<i64: 1, 8, 32>}, {pipeline_mode = #tpu.pipeline_mode<synchronous>, transform_indices = @transform_1, window_bounds = array<i64: 3, 32, 32>}, {pipeline_mode = #tpu.pipeline_mode<synchronous>, transform_indices = @transform_2, window_bounds = array<i64: 3, 1, 32>}, {pipeline_mode = #tpu.pipeline_mode<synchronous>, transform_indices = @transform_3, window_bounds = array<i64: 32, 32>}, {pipeline_mode = #tpu.pipeline_mode<synchronous>, transform_indices = @transform_4, window_bounds = array<i64: 1, 32>}, {transform_indices = @transform_5, window_bounds = array<i64: 1, 8, 32>}]} {
    %c0 = arith.constant 0 : index
    %c0_0 = arith.constant 0 : index
    %c0_1 = arith.constant 0 : index
    %0 = vector.load %arg3[%c0, %c0_0, %c0_1] : memref<1x8x32xf32, #tpu.memory_space<vmem>>, vector<1x8x32xf32>
    %1 = vector.shape_cast %0 : vector<1x8x32xf32> to vector<8x32xf32>
    %2 = arith.truncf %1 : vector<8x32xf32> to vector<8x32xbf16>
    %c0_i32 = arith.constant 0 : i32
    %3 = arith.cmpi eq, %arg1, %c0_i32 : i32
    %c0_i32_2 = arith.constant 0 : i32
    %4 = arith.cmpi eq, %arg2, %c0_i32_2 : i32
    %5 = arith.andi %3, %4 : i1
    %6 = arith.extui %5 : i1 to i32
    %c0_i32_3 = arith.constant 0 : i32
    %7 = arith.cmpi ne, %6, %c0_i32_3 : i32
    scf.if %7 {
      %cst = arith.constant 0.000000e+00 : f32
      %14 = vector.broadcast %cst : f32 to vector<1x32x32xf32>
      %c0_7 = arith.constant 0 : index
      %c0_8 = arith.constant 0 : index
      %c0_9 = arith.constant 0 : index
      %15 = vector.load %arg9[%c0_7, %c0_8, %c0_9] : memref<1x32x32xf32, #tpu.memory_space<vmem>>, vector<1x32x32xf32>
      tpu.vector_store %arg9[%c0_7, %c0_8, %c0_9], %14 {strides = array<i32>} : memref<1x32x32xf32, #tpu.memory_space<vmem>>, vector<1x32x32xf32>,
      %cst_10 = arith.constant 0.000000e+00 : f32
      %16 = vector.broadcast %cst_10 : f32 to vector<1x1x32xf32>
      %c0_11 = arith.constant 0 : index
      %c0_12 = arith.constant 0 : index
      %c0_13 = arith.constant 0 : index
      %17 = vector.load %arg10[%c0_11, %c0_12, %c0_13] : memref<1x1x32xf32, #tpu.memory_space<vmem>>, vector<1x1x32xf32>
      tpu.vector_store %arg10[%c0_11, %c0_12, %c0_13], %16 {strides = array<i32>} : memref<1x1x32xf32, #tpu.memory_space<vmem>>, vector<1x1x32xf32>,
    } else {
    }
    %c0_i32_4 = arith.constant 0 : i32
    %8 = arith.cmpi eq, %arg1, %c0_i32_4 : i32
    %9 = arith.extui %8 : i1 to i32
    %c0_i32_5 = arith.constant 0 : i32
    %10 = arith.cmpi ne, %9, %c0_i32_5 : i32
    scf.if %10 {
      %c1 = arith.constant 1 : index
      %c0_7 = arith.constant 0 : index
      %c0_8 = arith.constant 0 : index
      %14 = vector.load %arg4[%c1, %c0_7, %c0_8] : memref<3x32x32xbf16, #tpu.memory_space<vmem>>, vector<1x32x32xbf16>
      %15 = vector.shape_cast %14 : vector<1x32x32xbf16> to vector<32x32xbf16>
      %cst = arith.constant dense<0.000000e+00> : vector<8x32xf32>
      %16 = tpu.matmul %2, %15, %cst {dimension_numbers = #tpu.dot_dimension_numbers<[1], [0], [0], [1], [0, 0, 1, 1], [], []>} : vector<8x32xbf16>, vector<32x32xbf16>, vector<8x32xf32> -> vector<8x32xf32>
      %c1_9 = arith.constant 1 : index
      %c0_10 = arith.constant 0 : index
      %c0_11 = arith.constant 0 : index
      %17 = vector.load %arg5[%c1_9, %c0_10, %c0_11] : memref<3x1x32xf32, #tpu.memory_space<vmem>>, vector<1x1x32xf32>
      %18 = vector.shape_cast %17 : vector<1x1x32xf32> to vector<1x32xf32>
      %19 = vector.broadcast %18 : vector<1x32xf32> to vector<8x32xf32>
      %20 = arith.addf %16, %19 : vector<8x32xf32>
      %c2 = arith.constant 2 : index
      %c0_12 = arith.constant 0 : index
      %c0_13 = arith.constant 0 : index
      %21 = vector.load %arg4[%c2, %c0_12, %c0_13] : memref<3x32x32xbf16, #tpu.memory_space<vmem>>, vector<1x32x32xbf16>
      %22 = vector.shape_cast %21 : vector<1x32x32xbf16> to vector<32x32xbf16>
      %cst_14 = arith.constant dense<0.000000e+00> : vector<8x32xf32>
      %23 = tpu.matmul %2, %22, %cst_14 {dimension_numbers = #tpu.dot_dimension_numbers<[1], [0], [0], [1], [0, 0, 1, 1], [], []>} : vector<8x32xbf16>, vector<32x32xbf16>, vector<8x32xf32> -> vector<8x32xf32>
      %c2_15 = arith.constant 2 : index
      %c0_16 = arith.constant 0 : index
      %c0_17 = arith.constant 0 : index
      %24 = vector.load %arg5[%c2_15, %c0_16, %c0_17] : memref<3x1x32xf32, #tpu.memory_space<vmem>>, vector<1x1x32xf32>
      %25 = vector.shape_cast %24 : vector<1x1x32xf32> to vector<1x32xf32>
      %26 = vector.broadcast %25 : vector<1x32xf32> to vector<8x32xf32>
      %27 = arith.addf %23, %26 : vector<8x32xf32>
      %cst_18 = arith.constant dense<0.000000e+00> : vector<8xf32>
      %28 = vector.multi_reduction <add>, %20, %cst_18 [1] : vector<8x32xf32> to vector<8xf32>
      %29 = vector.shape_cast %28 : vector<8xf32> to vector<8x1xf32>
      %cst_19 = arith.constant 3.200000e+01 : f32
      %30 = vector.broadcast %cst_19 : f32 to vector<8x1xf32>
      %31 = arith.divf %29, %30 : vector<8x1xf32>
      %32 = vector.broadcast %31 : vector<8x1xf32> to vector<8x32xf32>
      %33 = arith.subf %20, %32 : vector<8x32xf32>
      %34 = arith.mulf %33, %33 : vector<8x32xf32>
      %cst_20 = arith.constant dense<0.000000e+00> : vector<8xf32>
      %35 = vector.multi_reduction <add>, %34, %cst_20 [1] : vector<8x32xf32> to vector<8xf32>
      %36 = vector.shape_cast %35 : vector<8xf32> to vector<8x1xf32>
      %cst_21 = arith.constant 1.000000e-07 : f32
      %37 = vector.broadcast %cst_21 : f32 to vector<8x1xf32>
      %38 = arith.addf %36, %37 : vector<8x1xf32>
      %39 = tpu.reciprocal %38 {approx = true} : vector<8x1xf32> -> vector<8x1xf32>
      %40 = vector.broadcast %39 : vector<8x1xf32> to vector<8x32xf32>
      %41 = arith.mulf %34, %40 : vector<8x32xf32>
      %42 = vector.shape_cast %41 : vector<8x32xf32> to vector<1x8x32xf32>
      %43 = vector.shape_cast %27 : vector<8x32xf32> to vector<1x8x32xf32>
      %c0_22 = arith.constant 0 : index
      %c0_23 = arith.constant 0 : index
      %c0_24 = arith.constant 0 : index
      %44 = vector.load %arg10[%c0_22, %c0_23, %c0_24] : memref<1x1x32xf32, #tpu.memory_space<vmem>>, vector<1x1x32xf32>
      %45 = arith.mulf %42, %42 : vector<1x8x32xf32>
      %cst_25 = arith.constant dense<0.000000e+00> : vector<1x32xf32>
      %46 = vector.multi_reduction <add>, %45, %cst_25 [1] : vector<1x8x32xf32> to vector<1x32xf32>
      %47 = vector.shape_cast %46 : vector<1x32xf32> to vector<1x1x32xf32>
      %48 = arith.addf %44, %47 : vector<1x1x32xf32>
      %c0_26 = arith.constant 0 : index
      %c0_27 = arith.constant 0 : index
      %c0_28 = arith.constant 0 : index
      %49 = vector.load %arg10[%c0_26, %c0_27, %c0_28] : memref<1x1x32xf32, #tpu.memory_space<vmem>>, vector<1x1x32xf32>
      tpu.vector_store %arg10[%c0_26, %c0_27, %c0_28], %48 {strides = array<i32>} : memref<1x1x32xf32, #tpu.memory_space<vmem>>, vector<1x1x32xf32>,
      %c0_29 = arith.constant 0 : index
      %c0_30 = arith.constant 0 : index
      %c0_31 = arith.constant 0 : index
      %50 = vector.load %arg9[%c0_29, %c0_30, %c0_31] : memref<1x32x32xf32, #tpu.memory_space<vmem>>, vector<1x32x32xf32>
      %51 = arith.truncf %42 : vector<1x8x32xf32> to vector<1x8x32xbf16>
      %52 = arith.truncf %43 : vector<1x8x32xf32> to vector<1x8x32xbf16>
      %cst_32 = arith.constant dense<0.000000e+00> : vector<1x32x32xf32>
      %53 = tpu.matmul %51, %52, %cst_32 {dimension_numbers = #tpu.dot_dimension_numbers<[1], [1], [2], [2], [0, 0, 0, 2, 1, 2], [0], [0]>} : vector<1x8x32xbf16>, vector<1x8x32xbf16>, vector<1x32x32xf32> -> vector<1x32x32xf32>
      %54 = arith.addf %50, %53 : vector<1x32x32xf32>
      %c0_33 = arith.constant 0 : index
      %c0_34 = arith.constant 0 : index
      %c0_35 = arith.constant 0 : index
      %55 = vector.load %arg9[%c0_33, %c0_34, %c0_35] : memref<1x32x32xf32, #tpu.memory_space<vmem>>, vector<1x32x32xf32>
      tpu.vector_store %arg9[%c0_33, %c0_34, %c0_35], %54 {strides = array<i32>} : memref<1x32x32xf32, #tpu.memory_space<vmem>>, vector<1x32x32xf32>,
    } else {
    }
    %c1_i32 = arith.constant 1 : i32
    %11 = arith.cmpi eq, %arg1, %c1_i32 : i32
    %12 = arith.extui %11 : i1 to i32
    %c0_i32_6 = arith.constant 0 : i32
    %13 = arith.cmpi ne, %12, %c0_i32_6 : i32
    scf.if %13 {
      %c0_7 = arith.constant 0 : index
      %c0_8 = arith.constant 0 : index
      %c0_9 = arith.constant 0 : index
      %14 = vector.load %arg4[%c0_7, %c0_8, %c0_9] : memref<3x32x32xbf16, #tpu.memory_space<vmem>>, vector<1x32x32xbf16>
      %15 = vector.shape_cast %14 : vector<1x32x32xbf16> to vector<32x32xbf16>
      %cst = arith.constant dense<0.000000e+00> : vector<8x32xf32>
      %16 = tpu.matmul %2, %15, %cst {dimension_numbers = #tpu.dot_dimension_numbers<[1], [0], [0], [1], [0, 0, 1, 1], [], []>} : vector<8x32xbf16>, vector<32x32xbf16>, vector<8x32xf32> -> vector<8x32xf32>
      %c0_10 = arith.constant 0 : index
      %c0_11 = arith.constant 0 : index
      %c0_12 = arith.constant 0 : index
      %17 = vector.load %arg5[%c0_10, %c0_11, %c0_12] : memref<3x1x32xf32, #tpu.memory_space<vmem>>, vector<1x1x32xf32>
      %18 = vector.shape_cast %17 : vector<1x1x32xf32> to vector<1x32xf32>
      %19 = vector.broadcast %18 : vector<1x32xf32> to vector<8x32xf32>
      %20 = arith.addf %16, %19 : vector<8x32xf32>
      %c2 = arith.constant 2 : index
      %c0_13 = arith.constant 0 : index
      %c0_14 = arith.constant 0 : index
      %21 = vector.load %arg4[%c2, %c0_13, %c0_14] : memref<3x32x32xbf16, #tpu.memory_space<vmem>>, vector<1x32x32xbf16>
      %22 = vector.shape_cast %21 : vector<1x32x32xbf16> to vector<32x32xbf16>
      %cst_15 = arith.constant dense<0.000000e+00> : vector<8x32xf32>
      %23 = tpu.matmul %2, %22, %cst_15 {dimension_numbers = #tpu.dot_dimension_numbers<[1], [0], [0], [1], [0, 0, 1, 1], [], []>} : vector<8x32xbf16>, vector<32x32xbf16>, vector<8x32xf32> -> vector<8x32xf32>
      %c2_16 = arith.constant 2 : index
      %c0_17 = arith.constant 0 : index
      %c0_18 = arith.constant 0 : index
      %24 = vector.load %arg5[%c2_16, %c0_17, %c0_18] : memref<3x1x32xf32, #tpu.memory_space<vmem>>, vector<1x1x32xf32>
      %25 = vector.shape_cast %24 : vector<1x1x32xf32> to vector<1x32xf32>
      %26 = vector.broadcast %25 : vector<1x32xf32> to vector<8x32xf32>
      %27 = arith.addf %23, %26 : vector<8x32xf32>
      %cst_19 = arith.constant dense<0.000000e+00> : vector<8xf32>
      %28 = vector.multi_reduction <add>, %20, %cst_19 [1] : vector<8x32xf32> to vector<8xf32>
      %29 = vector.shape_cast %28 : vector<8xf32> to vector<8x1xf32>
      %cst_20 = arith.constant 3.200000e+01 : f32
      %30 = vector.broadcast %cst_20 : f32 to vector<8x1xf32>
      %31 = arith.divf %29, %30 : vector<8x1xf32>
      %32 = vector.broadcast %31 : vector<8x1xf32> to vector<8x32xf32>
      %33 = arith.subf %20, %32 : vector<8x32xf32>
      %34 = arith.mulf %33, %33 : vector<8x32xf32>
      %35 = arith.mulf %34, %34 : vector<8x32xf32>
      %cst_21 = arith.constant dense<0.000000e+00> : vector<8xf32>
      %36 = vector.multi_reduction <add>, %35, %cst_21 [1] : vector<8x32xf32> to vector<8xf32>
      %37 = vector.shape_cast %36 : vector<8xf32> to vector<8x1xf32>
      %cst_22 = arith.constant 1.000000e-24 : f32
      %38 = vector.broadcast %cst_22 : f32 to vector<8x1xf32>
      %39 = arith.maximumf %37, %38 : vector<8x1xf32>
      %40 = math.rsqrt %39 : vector<8x1xf32>
      %41 = vector.broadcast %40 : vector<8x1xf32> to vector<8x32xf32>
      %42 = arith.mulf %34, %41 : vector<8x32xf32>
      %43 = vector.shape_cast %42 : vector<8x32xf32> to vector<1x8x32xf32>
      %44 = vector.shape_cast %27 : vector<8x32xf32> to vector<1x8x32xf32>
      %c0_23 = arith.constant 0 : index
      %c0_24 = arith.constant 0 : index
      %c0_25 = arith.constant 0 : index
      %45 = vector.load %arg10[%c0_23, %c0_24, %c0_25] : memref<1x1x32xf32, #tpu.memory_space<vmem>>, vector<1x1x32xf32>
      %cst_26 = arith.constant 1.000000e-24 : f32
      %46 = vector.broadcast %cst_26 : f32 to vector<1x1x32xf32>
      %47 = arith.maximumf %45, %46 : vector<1x1x32xf32>
      %cst_27 = arith.constant 8.000000e+00 : f32
      %48 = vector.broadcast %cst_27 : f32 to vector<1x1x32xf32>
      %49 = arith.mulf %47, %48 : vector<1x1x32xf32>
      %50 = math.rsqrt %49 : vector<1x1x32xf32>
      %51 = vector.broadcast %50 : vector<1x1x32xf32> to vector<1x8x32xf32>
      %52 = arith.mulf %43, %51 : vector<1x8x32xf32>
      %53 = arith.truncf %52 : vector<1x8x32xf32> to vector<1x8x32xbf16>
      %c0_28 = arith.constant 0 : index
      %c0_29 = arith.constant 0 : index
      %c0_30 = arith.constant 0 : index
      %54 = vector.load %arg9[%c0_28, %c0_29, %c0_30] : memref<1x32x32xf32, #tpu.memory_space<vmem>>, vector<1x32x32xf32>
      %55 = arith.truncf %54 : vector<1x32x32xf32> to vector<1x32x32xbf16>
      %cst_31 = arith.constant dense<0.000000e+00> : vector<1x8x32xf32>
      %56 = tpu.matmul %53, %55, %cst_31 {dimension_numbers = #tpu.dot_dimension_numbers<[2], [1], [1], [2], [0, 0, 0, 1, 1, 2], [0], [0]>} : vector<1x8x32xbf16>, vector<1x32x32xbf16>, vector<1x8x32xf32> -> vector<1x8x32xf32>
      %57 = arith.addf %44, %56 : vector<1x8x32xf32>
      %58 = vector.shape_cast %57 : vector<1x8x32xf32> to vector<8x32xf32>
      %59 = arith.truncf %58 : vector<8x32xf32> to vector<8x32xbf16>
      %c0_32 = arith.constant 0 : index
      %c0_33 = arith.constant 0 : index
      %60 = vector.load %arg6[%c0_32, %c0_33] : memref<32x32xbf16, #tpu.memory_space<vmem>>, vector<32x32xbf16>
      %cst_34 = arith.constant dense<0.000000e+00> : vector<8x32xf32>
      %61 = tpu.matmul %59, %60, %cst_34 {dimension_numbers = #tpu.dot_dimension_numbers<[1], [0], [0], [1], [0, 0, 1, 1], [], []>} : vector<8x32xbf16>, vector<32x32xbf16>, vector<8x32xf32> -> vector<8x32xf32>
      %c0_35 = arith.constant 0 : index
      %c0_36 = arith.constant 0 : index
      %62 = vector.load %arg7[%c0_35, %c0_36] : memref<1x32xf32, #tpu.memory_space<vmem>>, vector<1x32xf32>
      %63 = vector.broadcast %62 : vector<1x32xf32> to vector<8x32xf32>
      %64 = arith.addf %61, %63 : vector<8x32xf32>
      %65 = vector.shape_cast %64 : vector<8x32xf32> to vector<1x8x32xf32>
      %c0_37 = arith.constant 0 : index
      %c0_38 = arith.constant 0 : index
      %c0_39 = arith.constant 0 : index
      %66 = vector.load %arg8[%c0_37, %c0_38, %c0_39] : memref<1x8x32xf32, #tpu.memory_space<vmem>>, vector<1x8x32xf32>
      tpu.vector_store %arg8[%c0_37, %c0_38, %c0_39], %65 {strides = array<i32>} : memref<1x8x32xf32, #tpu.memory_space<vmem>>, vector<1x8x32xf32>,
    } else {
    }
    return
  }
  func.func @transform_0(%arg0: i32, %arg1: i32, %arg2: i32) -> (i32, i32, i32) {
    %c0_i32 = arith.constant 0 : i32
    %c0_i32_0 = arith.constant 0 : i32
    return %arg0, %arg2, %c0_i32 : i32, i32, i32
  }
  func.func @transform_1(%arg0: i32, %arg1: i32, %arg2: i32) -> (i32, i32, i32) {
    %c0_i32 = arith.constant 0 : i32
    %c0_i32_0 = arith.constant 0 : i32
    %c0_i32_1 = arith.constant 0 : i32
    %c0_i32_2 = arith.constant 0 : i32
    return %c0_i32, %c0_i32_0, %c0_i32_1 : i32, i32, i32
  }
  func.func @transform_2(%arg0: i32, %arg1: i32, %arg2: i32) -> (i32, i32, i32) {
    %c0_i32 = arith.constant 0 : i32
    %c0_i32_0 = arith.constant 0 : i32
    %c0_i32_1 = arith.constant 0 : i32
    %c0_i32_2 = arith.constant 0 : i32
    return %c0_i32, %c0_i32_0, %c0_i32_1 : i32, i32, i32
  }
  func.func @transform_3(%arg0: i32, %arg1: i32, %arg2: i32) -> (i32, i32) {
    %c0_i32 = arith.constant 0 : i32
    %c0_i32_0 = arith.constant 0 : i32
    %c0_i32_1 = arith.constant 0 : i32
    return %c0_i32, %c0_i32_0 : i32, i32
  }
  func.func @transform_4(%arg0: i32, %arg1: i32, %arg2: i32) -> (i32, i32) {
    %c0_i32 = arith.constant 0 : i32
    %c0_i32_0 = arith.constant 0 : i32
    %c0_i32_1 = arith.constant 0 : i32
    return %c0_i32, %c0_i32_0 : i32, i32
  }
  func.func @transform_5(%arg0: i32, %arg1: i32, %arg2: i32) -> (i32, i32, i32) {
    %0 = arith.muli %arg2, %arg1 : i32
    %c0_i32 = arith.constant 0 : i32
    %c0_i32_0 = arith.constant 0 : i32
    return %arg0, %0, %c0_i32 : i32, i32, i32
  }
}

</mosaic_0001>

<bundles_post_ra>
// kernel: tpu_custom_call.1
= control target key start
LH: loop header
LB: loop body
LE: loop exit
PB: predicated region body
PF: predicated region fallthrough
CT: control target
= control target key end

     0   :  { %s1754_s0 = inlined_call_operand.hbm [shape: f32[2,8,32], index: 0, kind: input, shape index: {}]   ;;  %s1755_s1 = inlined_call_operand.hbm [shape: bf16[3,32,32], index: 1, kind: input, shape index: {}]   ;;  %s1756_s2 = inlined_call_operand.vmem [shape: f32[3,1,32], index: 2, kind: input, shape index: {}]   ;;  %s1757_s3 = inlined_call_operand.hbm [shape: bf16[32,32], index: 3, kind: input, shape index: {}]   ;;  %s1758_s4 = inlined_call_operand.vmem [shape: f32[1,32], index: 4, kind: input, shape index: {}]   ;;  %s1759_s5 = inlined_call_operand.hbm [shape: f32[2,8,32], index: 5, kind: output, shape index: {}]  }
   0x1   :  { %1766 = sst [smem:[#allocation16_spill]] %s1755_s1 }
   0x2   :  { %10 = vsyncpa [#allocation5], 0 }
   0x3   :  { %12 = vsyncpa [#allocation5 + $0x1], 0 }
   0x4   :  { %13 = vsyncpa [#allocation8], 0 }
   0x5   :  { %14 = vsyncpa [#allocation6], 0 }
   0x6   :  { %16 = vsyncpa [#allocation6 + $0x1], 0  ;;  %s1447_s18 = smov 0   ;;  %s1449_s19 = smov 0  }
   0x7   :  { %s1451_s20 = smov 0   ;;  %s1453_s21 = smov 0  }
   0x8   :  { %s1455_s22 = smov 0   ;;  %s1457_s23 = smov 0  }
   0x9   :  { %s1459_s24 = smov 0   ;;  %s1461_s25 = smov 0  }
   0xa LB: > { %1767 = sst [smem:[#allocation14_spill]] %s1376_s18  ;;  %s965_s26 = sadd.s32 4294967295, %s1404_s25   ;;  %s1404_s25 = sphi %s1461_s25, %s22_s25   ;;  %s1400_s24 = sphi %s1459_s24, %s1792_s24   ;;  %s1396_s23 = sphi %s1457_s23, %s1791_s23   ;;  %s1392_s22 = sphi %s1455_s22, %s1790_s22   ;;  %s1388_s21 = sphi %s1453_s21, %s1789_s21   ;;  %s1384_s20 = sphi %s1451_s20, %s1788_s20   ;;  %s1380_s19 = sphi %s1449_s19, %s1787_s19   ;;  %s1376_s18 = sphi %s1447_s18, %s1786_s18  }
   0xb   : > { %s966_s27 = sadd.s32 4294967294, %s1404_s25   ;;  %p63_p0 = scmp.ne.s32.totalorder %s1380_s19, %s1376_s18 }
   0xc   : > { %p1491_p1 = scmp.eq.s32.totalorder %s965_s26, 0  ;;  %p1495_p2 = scmp.eq.s32.totalorder %s965_s26, 3 }
   0xd   : > { %p181_p3 = scmp.eq.s32.totalorder %s966_s27, 3  ;;  %p967_p5 = scmp.ge.s32.totalorder %s1404_s25, 1 }
   0xe   : > { %s1768_s28 = scalar_select %p1491_p1, 1, 0 }
   0xf   : > { %s1769_s29 = scalar_select %p1495_p2, 1, 0 }
  0x10   : > { %p1501_p4 = por %p1491_p1, %p63_p0  ;;  %p1506_p6 = por %p181_p3, %p63_p0 }
  0x11   : > { %p188_p7 = scmp.lt.s32.totalorder %s1404_s25, 5  ;;  %s1406_s8 = smov [#allocation7]  }
  0x12   : > { %s1770_s30 = scalar_select %p1501_p4, 1, 0 }
  0x13   : > { %s1771_s6 = scalar_select %p1506_p6, 1, 0 }
  0x14   : > { %p1511_p8 = pnand %p967_p5, %p188_p7  ;;  %s200_s9 = sshll.u32 %s1406_s8, 4  ;;  %s201_s9 = int_to_ptr.vmem [resolvable:$true] %s200_s9 }
  0x15   : > { %1772 = sst [smem:[#allocation15_spill]] %s1771_s6  ;;  %s1407_s11 = smov [#allocation9]  }
  0x16   : > { %s1773_s7 = scalar_select %p1511_p8, 1, 0 }
  0x17   : > { %p1105_p9 = pneg %p1511_p8  ;;  %s216_s12 = sshll.u32 %s1407_s11, 4  ;;  %s1523_s12 = int_to_ptr.vmem [resolvable:$true] %s216_s12 }
  0x18   : > { %s1775_s1 = sld [smem:[#allocation16_spill]] }
  0x19   : > { %p1519_p10 = pnand %p1105_p9, %p1491_p1 }
  0x1b   : > { %p1218_p12 = pneg %p1519_p10 }
  0x1e   : > { %s1216_s15 = scalar_lea.hbm %s1775_s1, 768 }
  0x1f   : > { %p1217_p11 = scmp.ne.s32.totalorder %s1775_s1, %s1216_s15  ;;  %p1223_p3 = scmp.lt.u32.totalorder %s1216_s15, %s1775_s1 }
  0x21   : > { %p1219_p13 = pnand %p1218_p12, %p1217_p11 }
  0x23   : > { %p1220_p0 = pneg %p1219_p13 }
  0x25   : > { %p1225_p5 = pnand %p1223_p3, %p1220_p0 }
  0x27   : > { %1228 = shalt.err (!%p1225_p5)
}
  0x28   : > { %s1229_s8 = scalar_lea.vmem %s201_s9, 768  ;;  %p1237_p1 = scmp.lt.s32.totalorder %s201_s9, %s201_s9 }
  0x29   : > { %p1230_p7 = scmp.ne.s32.totalorder %s201_s9, %s1229_s8  ;;  %p1238_p4 = scmp.lt.s32.totalorder %s1229_s8, %s1229_s8 }
  0x2b   : > { %p1232_p9 = pnand %p1230_p7, %p1218_p12  ;;  %p1239_p8 = por %p1238_p4, %p1237_p1 }
  0x2d   : > { %p1233_p6 = pneg %p1232_p9 }
  0x2f   : > { %p1240_p2 = pnand %p1239_p8, %p1233_p6 }
  0x31   : > { %1243 = shalt.err (!%p1240_p2)
}
  0x32   : > { %s1408_s11 = smov 64   ;;  %s1409_s13 = smov 4  }
  0x33   : > { %1108 = dma.hbm_to_vmem [thread:$0]  (!%p1519_p10), %s1775_s1, 768, %s201_s9, [#allocation8], %s1408_s11, %s1408_s11, %s1409_s13  }
  0x34   : > { %s1244_s26 = scalar_lea.hbm %s1757_s3, 256 }
  0x35   : > { %p1245_p11 = scmp.ne.s32.totalorder %s1757_s3, %s1244_s26  ;;  %p1251_p4 = scmp.lt.u32.totalorder %s1244_s26, %s1757_s3 }
  0x37   : > { %p1247_p1 = pnand %p1245_p11, %p1218_p12 }
  0x39   : > { %p1248_p2 = pneg %p1247_p1 }
  0x3b   : > { %p1253_p6 = pnand %p1251_p4, %p1248_p2 }
  0x3d   : > { %1256 = shalt.err (!%p1253_p6)
}
  0x3e   : > { %s1257_s9 = scalar_lea.vmem %s1523_s12, 256  ;;  %p1265_p3 = scmp.lt.s32.totalorder %s1523_s12, %s1523_s12 }
  0x3f   : > { %p1258_p8 = scmp.ne.s32.totalorder %s1523_s12, %s1257_s9  ;;  %p1266_p5 = scmp.lt.s32.totalorder %s1257_s9, %s1257_s9 }
  0x41   : > { %p1260_p13 = pnand %p1258_p8, %p1218_p12  ;;  %p1267_p7 = por %p1266_p5, %p1265_p3 }
  0x43   : > { %p1261_p0 = pneg %p1260_p13 }
  0x45   : > { %p1268_p9 = pnand %p1267_p7, %p1261_p0 }
  0x47   : > { %1271 = shalt.err (!%p1268_p9)
}
  0x48   : > { %1111 = dma.hbm_to_vmem [thread:$0]  (!%p1519_p10), %s1757_s3, 256, %s1523_s12, [#allocation8], %s1408_s11, %s1408_s11, %s1409_s13  }
  0x49   : > { %s37_s14 = sadd.s32 1, %s1396_s23  ;;  %s41_s15 = sadd.s32 1, %s1400_s24 }
  0x4a   : > { %p39_p12 = scmp.ge.s32.totalorder %s37_s14, 2  ;;  %s50_s10 = sadd.s32 1, %s1384_s20 }
  0x4b   : > { %p57_p11 = scmp.ne.s32.totalorder %s1384_s20, %s1380_s19  ;;  %p58_p1 = scmp.eq.s32.totalorder %s1404_s25, 0 }
  0x4c   : > { %s1794_s14 = smov (%p39_p12, %s37_s14), 0  ;;  %s1796_s15 = smov (!%p39_p12, %s41_s15), %s1400_s24 }
  0x4d   : > { %p1581_p2 = por %p58_p1, %p57_p11  ;;  %p1777_p4 = scmp.ne.s32.totalorder %s1769_s29, 0 }
  0x4e   : > { %p43_p10 = scmp.ge.s32.totalorder %s1796_s15, 2  ;;  %p1122_p8 = scmp.lt.s32.totalorder %s1404_s25, 4 }
  0x4f   : > { %p1587_p6 = por %p1777_p4, %p57_p11  ;;  %s233_s12 = sand.u32 1, %s1384_s20  }
  0x50   : > { %s972_s11 = sshll.u32 %s1400_s24, 7  ;;  %s1798_s15 = smov (%p43_p10, %s1796_s15), 0 }
  0x51   : > { %s971_s13 = sshll.u32 %s233_s12, 3  ;;  %s45_s26 = ssub.s32 %s1400_s24, %s1798_s15 }
  0x52   : > { %p48_p13 = scmp.eq.s32.totalorder %s45_s26, 0  ;;  %s1601_s9 = scalar_lea.hbm %s1754_s0, %s972_s11 }
  0x53   : > { %s237_s29 = scalar_lea.vmem [#allocation4], %s971_s13  ;;  %p1605_p0 = pnand %p1122_p8, %p1581_p2 }
  0x54   : > { %s245_s18 = sshll.u32 %s237_s29, 4  ;;  %s234_s26 = scalar_lea.sflag [#allocation5], %s233_s12  ;;  %s1612_s18 = int_to_ptr.vmem [resolvable:$true] %s245_s18 }
  0x55   : > { %s1610_s1 = scalar_select %p48_p13, %s1384_s20, %s50_s10  }
  0x56   : > { %s1272_s11 = scalar_lea.hbm %s1601_s9, 128  ;;  %p1274_p5 = pneg %p1605_p0 }
  0x57   : > { %p1273_p3 = scmp.ne.s32.totalorder %s1601_s9, %s1272_s11  ;;  %s1277_s27 = scalar_lea.hbm %s1754_s0, 256 }
  0x58   : > { %p1278_p12 = scmp.lt.u32.totalorder %s1601_s9, %s1754_s0  ;;  %p1279_p11 = scmp.lt.u32.totalorder %s1277_s27, %s1272_s11 }
  0x59   : > { %p1275_p7 = pnand %p1274_p5, %p1273_p3  ;;  %p1281_p2 = scmp.lt.u32.totalorder %s1272_s11, %s1601_s9 }
  0x5a   : > { %p1280_p1 = por %p1279_p11, %p1278_p12 }
  0x5b   : > { %p1276_p9 = pneg %p1275_p7 }
  0x5c   : > { %p1282_p4 = por %p1281_p2, %p1280_p1 }
  0x5e   : > { %p1283_p10 = pnand %p1282_p4, %p1276_p9 }
  0x60   : > { %1286 = shalt.err (!%p1283_p10)
}
  0x61   : > { %s1287_s10 = scalar_lea.vmem %s1612_s18, 128  ;;  %s1410_s12 = smov [#allocation4]  }
  0x62   : > { %p1288_p8 = scmp.ne.s32.totalorder %s1612_s18, %s1287_s10  ;;  %s1292_s16 = sshll.u32 %s1410_s12, 4  ;;  %s1293_s16 = int_to_ptr.vmem [resolvable:$false] %s1292_s16 }
  0x63   : > { %s1294_s13 = scalar_lea.vmem %s1293_s16, 256  ;;  %p1295_p7 = scmp.lt.s32.totalorder %s1612_s18, %s1293_s16 }
  0x64   : > { %p1290_p13 = pnand %p1288_p8, %p1274_p5  ;;  %p1296_p12 = scmp.lt.s32.totalorder %s1294_s13, %s1287_s10 }
  0x66   : > { %p1291_p3 = pneg %p1290_p13  ;;  %p1297_p11 = por %p1296_p12, %p1295_p7 }
  0x68   : > { %p1298_p1 = pnand %p1297_p11, %p1291_p3 }
  0x6a   : > { %1301 = shalt.err (!%p1298_p1)
}
  0x6b   : > { %1115 = dma.hbm_to_vmem [thread:$0]  (!%p1605_p0), %s1601_s9, 128, %s1612_s18, %s234_s26  }
  0x6c   : > { %p1780_p9 = scmp.ne.s32.totalorder %s1773_s7, 0 }
  0x6d   : > { %s1642_s11 = sand.u32 (!%p1780_p9), 1, %s1380_s19   ;;  %p1781_p5 = scmp.ne.s32.totalorder (!%p1780_p9), %s1770_s30, 0 }
  0x6e   : > { %254 = sbr.rel (%p1780_p9) target bundleno = 1980 (0x7bc), region = 40  ;;  %s974_s27 = sshll.u32 (!%p1780_p9), %s1642_s11, 3 }
  0x6f   : > { %s257_s8 = scalar_lea.sflag (!%p1780_p9), [#allocation5], %s1642_s11  ;;  %s260_s29 = scalar_lea.vmem (!%p1780_p9), [#allocation4], %s974_s27 }
  0x75   : > { %1363 = dma.done.wait (%p1781_p5), %s257_s8, 128  }
  0x76   : > { %1365 = vsyncadd (%p1781_p5), %s257_s8, 4294967168  ;;  %p1782_p2 = scmp.ne.s32.totalorder %s1768_s28, 0 }
  0x78   : > { %1367 = dma.done.wait (%p1782_p2), [#allocation8], 1024  }
  0x79   : > { %1369 = vsyncadd (%p1782_p2), [#allocation8], 4294966272  ;;  %p299_p0 = scmp.eq.s32.totalorder %s1388_s21, 0  ;;  %v297_v0 = vld [vmem:[%s260_s29] sm:$0xff]  ;;  %s1657_s7 = scalar_lea.vmem [#allocation10], %s974_s27 }
  0x7a   : > { %v1655_v1 = vpack.c.bf16 %v297_v0, %v297_v0  ;;  %vm305_vm0 = vcmask (%p299_p0), 261120   ;;  %vm310_vm1 = vcmask (%p299_p0), 253952   ;;  %v1411_v2 = vmov (%p299_p0), 0.0  }
  0x7b   : > { %304 = sbr.rel (!%p299_p0) target bundleno = 130 (0x82), region = 56  ;;  %306 = vst.msk [vmem:[#allocation2] sm:$0xff] (%p299_p0), %vm305_vm0, %v1411_v2  ;;  %307 = vst.msk [vmem:[#allocation2 + $0x8] sm:$0xff] (%p299_p0), %vm305_vm0, %v1411_v2 }
  0x7c   : > { %308 = vst.msk [vmem:[#allocation2 + $0x10] sm:$0xff] (%p299_p0), %vm305_vm0, %v1411_v2  ;;  %309 = vst.msk [vmem:[#allocation2 + $0x18] sm:$0xff] (%p299_p0), %vm305_vm0, %v1411_v2 }
  0x7d   : > { %311 = vst.msk [vmem:[#allocation3] sm:$0x1] (%p299_p0), %vm310_vm1, %v1411_v2 }
  0x82 PF: > { %p979_p4 = scmp.ne.s32.totalorder %s1388_s21, 0 }
  0x83   : > { %v1200_v3 = vld [vmem:[#allocation7 + $0x10] sm:$0xff] (!%p979_p4)   ;;  %v1412_v4 = vmov (!%p979_p4), 0.0   ;;  %v1201_v5 = vld [vmem:[#allocation7 + $0x18] sm:$0xff] (!%p979_p4)   ;;  %vm1413_vm2 = vmmov (!%p979_p4), 0   ;;  %vm340_vm3 = vcmask (!%p979_p4), 261120   ;;  %v1202_v13 = vld [vmem:[#allocation7 + $0x20] sm:$0xff] (!%p979_p4)  }
  0x84   : > { %314 = sbr.rel (%p979_p4) target bundleno = 988 (0x3dc), region = 60  ;;  %1033 = vmatprep.subr.bf16.mxu0 (!%p979_p4), %v1412_v4  ;;  %1041 = vmatprep.subr.bf16.mxu1 (!%p979_p4), %v1412_v4  ;;  %v981_v6 = vld [vmem:[%s1756_s2 + $0x1] ss:$0 sm:$0xff] (!%p979_p4)  ;;  %v1203_v14 = vld [vmem:[#allocation7 + $0x28] sm:$0xff] (!%p979_p4)   ;;  %v986_v20 = vld [vmem:[%s1756_s2 + $0x2] ss:$0 sm:$0xff] (!%p979_p4) }
  0x85   : > { %1034 = vmatpush3.bf16.msra.mxu0 (!%p979_p4), %v1200_v3  ;;  %1037 = vmatprep.mubr.msk.bf16.mxu0 (!%p979_p4), %vm1413_vm2, %v1412_v4  ;;  %vm503_vm4 = vcmask (!%p979_p4), 1043456   ;;  %v462_v40 = vld [vmem:[#allocation3] sm:$0x1] (!%p979_p4)  ;;  %vm472_vm5 = vcmask (!%p979_p4), 253952   ;;  %vm496_vm6 = vcmask (!%p979_p4), 64512   ;;  %v476_v45 = vld [vmem:[#allocation2 + $0x10] sm:$0xff] (!%p979_p4) }
  0x86   : > { %1035 = vmatprep.subr.bf16.mxu0 (!%p979_p4), %v1412_v4  ;;  %1045 = vmatprep.mubr.msk.bf16.mxu1 (!%p979_p4), %vm1413_vm2, %v1412_v4  ;;  %v474_v46 = vld [vmem:[#allocation2] sm:$0xff] (!%p979_p4)  ;;  %v477_v48 = vld [vmem:[#allocation2 + $0x18] sm:$0xff] (!%p979_p4)  ;;  %v475_v51 = vld [vmem:[#allocation2 + $0x8] sm:$0xff] (!%p979_p4) }
  0x87   : > { %1042 = vmatpush3.bf16.msra.mxu1 (!%p979_p4), %v1202_v13 }
  0x88   : > { %1043 = vmatprep.subr.bf16.mxu1 (!%p979_p4), %v1412_v4 }
  0x89   : > { %1036 = vmatpush3.bf16.msra.mxu0 (!%p979_p4), %v1201_v5 }
  0x8b   : > { %1044 = vmatpush3.bf16.msra.mxu1 %v1203_v14 }
  0x8c   : > { %1038 = vmatmul.mubr.msk.bf16.vlgmr.msra.gmra.mrb[0].mxu0 %vm340_vm3, %v1655_v1 }
  0x8e   : > { %1046 = vmatmul.mubr.msk.bf16.vlgmr.msra.gmra.mrb[0].mxu1 %vm340_vm3, %v1655_v1 }
 0x15f   : > { %v378_v7 = vpop.f32.mrb[0].mxu0 }
 0x160   : > { %v379_v8 = vadd.f32 %v981_v6, %v378_v7  ;;  %v1039_v9 = vpop.f32.mrb[1].mxu0 }
 0x161   : > { %v381_v10 = vpop.f32.mrb[2].mxu0  ;;  %v443_v21 = vpop.f32.mrb[0].mxu1 }
 0x162   : > { %v1040_v11 = vpop.f32.mrb[3].mxu0  ;;  %v449_v12 = vsel %vm340_vm3, %v379_v8, 0.0  ;;  %v444_v22 = vadd.f32 %v986_v20, %v443_v21  ;;  %v1047_v23 = vpop.f32.mrb[1].mxu1 }
 0x163   : > { %450 = vadd.xlane.f32.xlu0 %v449_v12  ;;  %v446_v24 = vpop.f32.mrb[2].mxu1 }
 0x164   : > { %v479_v25 = vpack.c.bf16 %v444_v22, %v444_v22  ;;  %v1048_v26 = vpop.f32.mrb[3].mxu1 }
 0x166   : > { %v505_v27 = vsel %vm503_vm4, %v479_v25, 0  ;;  %1092 = vmatprep.subr.msk.bf16.mxu0 %vm503_vm4, %v479_v25 }
 0x167   : > { %1050 = vmatpush3.bf16.msra.mxu0 %v505_v27 }
 0x1f0   : > { %v451_v15 = vpop.xlane.xlu0 %450 }
 0x1f1   : > { %v453_v16 = vmul.f32 0.03125, %v451_v15 }
 0x1f3   : > { %v454_v17 = vsub.f32 %v379_v8, %v453_v16 }
 0x1f5   : > { %v455_v18 = vmul.f32 %v454_v17, %v454_v17 }
 0x1f7   : > { %v456_v19 = vsel %vm340_vm3, %v455_v18, 0.0 }
 0x1f8   : > { %457 = vadd.xlane.f32.xlu0 %v456_v19 }
 0x285   : > { %v458_v28 = vpop.xlane.xlu0 %457 }
 0x286   : > { %v459_v29 = vadd.f32 1e-07, %v458_v28 }
 0x288   : > { %1204 = vrcp.f32 %v459_v29 }
 0x292   : > { %v1205_v30 = vpop.eup %1204 }
 0x293   : > { %v461_v31 = vmul.f32 %v1205_v30, %v455_v18 }
 0x295   : > { %v478_v32 = vpack.c.bf16 %v461_v31, %v461_v31  ;;  %v463_v33 = vmul.f32 %v461_v31, %v461_v31 }
 0x297   : > { %480 = vxpose.xlu1.c.b16.start.end [1/1] (short) (narrow) %v478_v32, 32  ;;  %v464_v34 = vsel %vm340_vm3, %v463_v33, 0.0 }
 0x298   : > { %v465_v35 = vrot.slane %v464_v34, 4 }
 0x29a   : > { %v466_v36 = vadd.f32 %v465_v35, %v464_v34 }
 0x29c   : > { %v467_v37 = vrot.slane %v466_v36, 2 }
 0x29e   : > { %v468_v38 = vadd.f32 %v467_v37, %v466_v36 }
 0x2a0   : > { %v469_v39 = vrot.slane %v468_v38, 1 }
 0x2a2   : > { %v470_v41 = vadd.f32 %v469_v39, %v468_v38 }
 0x2a4   : > { %v471_v42 = vadd.f32 %v470_v41, %v462_v40 }
 0x2a6   : > { %473 = vst.msk [vmem:[#allocation3] sm:$0x1] %vm472_vm5, %v471_v42 }
 0x2fd   : > { %v488_v43 = vpop.trf.xlu1 }
 0x2fe   : > { %1051 = vmatprep.mubr.msk.bf16.mxu0 %vm496_vm6, %v488_v43 }
 0x301   : > { %v489_v44 = vpop.trf.xlu1 }
 0x302   : > { %1052 = vmatmul.mubr.msk.bf16.vlgmr.msra.gmra.mrb[4].mxu0 %vm496_vm6, %v489_v44 }
 0x3d5   : > { %v1053_v47 = vpop.f32.mrb[4].mxu0 }
 0x3d6   : > { %v558_v49 = vadd.f32 %v1053_v47, %v476_v45  ;;  %v541_v50 = vpop.f32.mrb[5].mxu0 }
 0x3d7   : > { %v556_v52 = vadd.f32 %v541_v50, %v474_v46  ;;  %v1054_v53 = vpop.f32.mrb[6].mxu0 }
 0x3d8   : > { %562 = vst.msk [vmem:[#allocation2 + $0x10] sm:$0xff] %vm340_vm3, %v558_v49  ;;  %v559_v54 = vadd.f32 %v1054_v53, %v477_v48  ;;  %v544_v55 = vpop.f32.mrb[7].mxu0 }
 0x3d9   : > { %560 = vst.msk [vmem:[#allocation2] sm:$0xff] %vm340_vm3, %v556_v52  ;;  %v557_v56 = vadd.f32 %v544_v55, %v475_v51 }
 0x3da   : > { %563 = vst.msk [vmem:[#allocation2 + $0x18] sm:$0xff] %vm340_vm3, %v559_v54 }
 0x3db   : > { %561 = vst.msk [vmem:[#allocation2 + $0x8] sm:$0xff] %vm340_vm3, %v557_v56 }
 0x3dc PF: > { %p992_p10 = scmp.ne.s32.totalorder %s1388_s21, 1 }
 0x3dd   : > { %v1206_v57 = vld [vmem:[#allocation7] sm:$0xff] (!%p992_p10)   ;;  %v1414_v58 = vmov (!%p992_p10), 0.0   ;;  %v1207_v59 = vld [vmem:[#allocation7 + $0x8] sm:$0xff] (!%p992_p10)   ;;  %vm1415_vm7 = vmmov (!%p992_p10), 0   ;;  %vm591_vm8 = vcmask (!%p992_p10), 261120   ;;  %v1210_v18 = vld [vmem:[#allocation9] sm:$0xff] (!%p992_p10)  }
 0x3de   : > { %567 = sbr.rel (%p992_p10) target bundleno = 1956 (0x7a4), region = 64  ;;  %1055 = vmatprep.subr.bf16.mxu0 (!%p992_p10), %v1414_v58  ;;  %1063 = vmatprep.subr.bf16.mxu1 (!%p992_p10), %v1414_v58  ;;  %v993_v60 = vld [vmem:[%s1756_s2] ss:$0 sm:$0xff] (!%p992_p10)  ;;  %v1208_v4 = vld [vmem:[#allocation7 + $0x20] sm:$0xff] (!%p992_p10)   ;;  %v1211_v32 = vld [vmem:[#allocation9 + $0x8] sm:$0xff] (!%p992_p10)  }
 0x3df   : > { %1056 = vmatpush3.bf16.msra.mxu0 (!%p992_p10), %v1206_v57  ;;  %1059 = vmatprep.mubr.msk.bf16.mxu0 (!%p992_p10), %vm1415_vm7, %v1414_v58  ;;  %v1209_v11 = vld [vmem:[#allocation7 + $0x28] sm:$0xff] (!%p992_p10)   ;;  %v728_v15 = vld [vmem:[#allocation2 + $0x10] sm:$0xff] (!%p992_p10)  ;;  %v998_v33 = vld [vmem:[%s1756_s2 + $0x2] ss:$0 sm:$0xff] (!%p992_p10) }
 0x3e0   : > { %1057 = vmatprep.subr.bf16.mxu0 (!%p992_p10), %v1414_v58  ;;  %1067 = vmatprep.mubr.msk.bf16.mxu1 (!%p992_p10), %vm1415_vm7, %v1414_v58  ;;  %v726_v12 = vld [vmem:[#allocation2] sm:$0xff] (!%p992_p10) }
 0x3e1   : > { %1064 = vmatpush3.bf16.msra.mxu1 (!%p992_p10), %v1208_v4  ;;  %v729_v16 = vld [vmem:[#allocation2 + $0x18] sm:$0xff] (!%p992_p10)  ;;  %v714_v19 = vld [vmem:[#allocation3] sm:$0x1] (!%p992_p10) }
 0x3e2   : > { %1065 = vmatprep.subr.bf16.mxu1 (!%p992_p10), %v1414_v58  ;;  %v727_v13 = vld [vmem:[#allocation2 + $0x8] sm:$0xff] (!%p992_p10)  ;;  %v731_v17 = vpack.c.bf16 (!%p992_p10), %v729_v16, %v728_v15  ;;  %v715_v20 = vmax.f32 (!%p992_p10), %v714_v19, 1e-24  ;;  %v1003_v40 = vld [vmem:[%s1758_s4] ss:$0 sm:$0xff] (!%p992_p10) }
 0x3e3   : > { %1058 = vmatpush3.bf16.msra.mxu0 (!%p992_p10), %v1207_v59  ;;  %v730_v14 = vpack.c.bf16 (!%p992_p10), %v727_v13, %v726_v12 }
 0x3e4   : > { %1079 = vmatprep.subr.bf16.mxu0 (!%p992_p10), %v1414_v58  ;;  %v716_v21 = vmul.f32 (!%p992_p10), 8.0, %v715_v20 }
 0x3e5   : > { %1066 = vmatpush3.bf16.msra.mxu1 %v1209_v11 }
 0x3e6   : > { %1060 = vmatmul.mubr.msk.bf16.vlgmr.msra.gmra.mrb[0].mxu0 %vm591_vm8, %v1655_v1  ;;  %1071 = vmatprep.subr.bf16.mxu1 %v1414_v58  ;;  %1212 = vrsqrt.f32 %v716_v21 }
 0x3e7   : > { %1083 = vmatprep.mubr.msk.bf16.mxu0 %vm1415_vm7, %v1414_v58  ;;  %1080 = vmatpush3.bf16.msra.mxu0 %v1210_v18 }
 0x3e8   : > { %1068 = vmatmul.mubr.msk.bf16.vlgmr.msra.gmra.mrb[0].mxu1 %vm591_vm8, %v1655_v1  ;;  %1081 = vmatprep.subr.bf16.mxu0 %v1414_v58  ;;  %v719_v1 = vlaneseq }
 0x3e9   : > { %1075 = vmatprep.mubr.msk.bf16.mxu1 %vm1415_vm7, %v1414_v58  ;;  %1072 = vmatpush3.bf16.msra.mxu1 %v730_v14 }
 0x3ea   : > { %1073 = vmatprep.subr.bf16.mxu1 %v1414_v58  ;;  %v720_v24 = vshrl.u32 %v719_v1, 7 }
 0x3eb   : > { %1082 = vmatpush3.bf16.msra.mxu0 %v1211_v32 }
 0x3ec   : > { %v721_v25 = vsub.s32 0, %v720_v24 }
 0x3ed   : > { %1074 = vmatpush3.bf16.msra.mxu1 %v731_v17 }
 0x3f0   : > { %v1213_v26 = vpop.eup %1212 }
 0x3f1   : > { %v722_v27 = vrot.slane %v1213_v26, %v721_v25 }
 0x4b9   : > { %v629_v61 = vpop.f32.mrb[0].mxu0 }
 0x4ba   : > { %v630_v62 = vadd.f32 %v993_v60, %v629_v61  ;;  %v1061_v63 = vpop.f32.mrb[1].mxu0 }
 0x4bb   : > { %v632_v0 = vpop.f32.mrb[2].mxu0 }
 0x4bc   : > { %v1062_v2 = vpop.f32.mrb[3].mxu0  ;;  %v700_v3 = vsel %vm591_vm8, %v630_v62, 0.0 }
 0x4bd   : > { %701 = vadd.xlane.f32.xlu0 %v700_v3 }
 0x54a   : > { %v702_v5 = vpop.xlane.xlu0 %701 }
 0x54b   : > { %v704_v6 = vmul.f32 0.03125, %v702_v5 }
 0x54d   : > { %v705_v7 = vsub.f32 %v630_v62, %v704_v6 }
 0x54f   : > { %v706_v8 = vmul.f32 %v705_v7, %v705_v7 }
 0x551   : > { %v707_v9 = vmul.f32 %v706_v8, %v706_v8 }
 0x553   : > { %v708_v10 = vsel %vm591_vm8, %v707_v9, 0.0 }
 0x554   : > { %709 = vadd.xlane.f32.xlu0 %v708_v10 }
 0x5e1   : > { %v710_v22 = vpop.xlane.xlu0 %709 }
 0x5e2   : > { %v711_v23 = vmax.f32 %v710_v22, 1e-24 }
 0x5e4   : > { %1214 = vrsqrt.f32 %v711_v23 }
 0x5ee   : > { %v1215_v28 = vpop.eup %1214 }
 0x5ef   : > { %v713_v29 = vmul.f32 %v1215_v28, %v706_v8 }
 0x5f1   : > { %v724_v30 = vmul.f32 %v722_v27, %v713_v29 }
 0x5f3   : > { %v725_v31 = vpack.c.bf16 %v724_v30, %v724_v30 }
 0x5f5   : > { %1076 = vmatmul.mubr.msk.bf16.vlgmr.msra.gmra.mrb[0].mxu1 %vm591_vm8, %v725_v31 }
 0x6c8   : > { %v769_v34 = vpop.f32.mrb[0].mxu1 }
 0x6c9   : > { %v1087_v35 = vadd.f32 %v998_v33, %v769_v34  ;;  %v1077_v36 = vpop.f32.mrb[1].mxu1 }
 0x6ca   : > { %v772_v37 = vpop.f32.mrb[2].mxu1 }
 0x6cb   : > { %v776_v38 = vpack.c.bf16 %v1087_v35, %v1087_v35  ;;  %v1078_v39 = vpop.f32.mrb[3].mxu1 }
 0x6cd   : > { %1084 = vmatmul.mubr.msk.bf16.vlgmr.msra.gmra.mrb[4].mxu0 %vm591_vm8, %v776_v38 }
 0x7a0   : > { %v837_v41 = vpop.f32.mrb[4].mxu0 }
 0x7a1   : > { %v838_v42 = vadd.f32 %v1003_v40, %v837_v41  ;;  %v1085_v43 = vpop.f32.mrb[5].mxu0 }
 0x7a2   : > { %v840_v44 = vpop.f32.mrb[6].mxu0 }
 0x7a3   : > { %843 = vst.msk [vmem:[%s1657_s7] sm:$0xff] %vm591_vm8, %v838_v42  ;;  %v1086_v45 = vpop.f32.mrb[7].mxu0 }
 0x7a4 PF: > { %s1008_s13 = sshll.u32 %s1392_s22, 7  ;;  %s860_s28 = sshll.u32 %s1657_s7, 4  ;;  %s861_s28 = int_to_ptr.vmem [resolvable:$true] %s860_s28 }
 0x7a5   : > { %s1705_s29 = scalar_lea.hbm %s1759_s5, %s1008_s13  ;;  %s845_s30 = scalar_lea.sflag [#allocation6], %s1642_s11 }
 0x7a6   : > { %s1302_s9 = scalar_lea.vmem %s861_s28, 128  ;;  %s1416_s18 = smov [#allocation10]  }
 0x7a7   : > { %p1303_p8 = scmp.ne.s32.totalorder %s861_s28, %s1302_s9  ;;  %s1306_s21 = sshll.u32 %s1416_s18, 4  ;;  %s1307_s21 = int_to_ptr.vmem [resolvable:$false] %s1306_s21 }
 0x7a8   : > { %s1308_s6 = scalar_lea.vmem %s1307_s21, 256  ;;  %p1309_p7 = scmp.lt.s32.totalorder %s861_s28, %s1307_s21 }
 0x7a9   : > { %p1304_p13 = pnand %p1303_p8, %p1587_p6  ;;  %p1310_p12 = scmp.lt.s32.totalorder %s1308_s6, %s1302_s9 }
 0x7ab   : > { %p1305_p3 = pneg %p1304_p13  ;;  %p1311_p11 = por %p1310_p12, %p1309_p7 }
 0x7ad   : > { %p1312_p1 = pnand %p1311_p11, %p1305_p3 }
 0x7af   : > { %1315 = shalt.err (!%p1312_p1)
}
 0x7b0   : > { %s1316_s22 = scalar_lea.hbm %s1705_s29, 128  ;;  %s1320_s26 = scalar_lea.hbm %s1759_s5, 256 }
 0x7b1   : > { %p1317_p9 = scmp.ne.s32.totalorder %s1705_s29, %s1316_s22  ;;  %p1321_p0 = scmp.lt.u32.totalorder %s1705_s29, %s1759_s5 }
 0x7b2   : > { %p1322_p4 = scmp.lt.u32.totalorder %s1320_s26, %s1316_s22  ;;  %p1324_p8 = scmp.lt.u32.totalorder %s1316_s22, %s1705_s29 }
 0x7b3   : > { %p1318_p5 = pnand %p1317_p9, %p1587_p6 }
 0x7b4   : > { %p1323_p10 = por %p1322_p4, %p1321_p0 }
 0x7b5   : > { %p1319_p2 = pneg %p1318_p5 }
 0x7b6   : > { %p1325_p13 = por %p1324_p8, %p1323_p10 }
 0x7b8   : > { %p1326_p3 = pnand %p1325_p13, %p1319_p2 }
 0x7ba   : > { %1329 = shalt.err (!%p1326_p3)
}
 0x7bb   : > { %1103 = dma.vmem_to_hbm [thread:$0]  (%p1587_p6), %s861_s28, 128, %s1705_s29, %s845_s30  }
 0x7bc PF: > { %s1783_s16 = sld [smem:[#allocation14_spill]]  ;;  %s1784_s13 = sld [smem:[#allocation15_spill]] }
 0x7bd   : > { %p1125_p7 = scmp.ge.s32.totalorder %s1404_s25, 2 }
 0x7c2   : > { %s872_s27 = sand.u32 1, %s1783_s16   ;;  %p1785_p12 = scmp.ne.s32.totalorder %s1784_s13, 0 }
 0x7c3   : > { %s873_s8 = scalar_lea.sflag [#allocation6], %s872_s27 }
 0x7c4   : > { %p1117_p11 = pnand %p1125_p7, %p1785_p12 }
 0x7c6   : > { %1371 = dma.done.wait (!%p1117_p11), %s873_s8, 128  }
 0x7c7   : > { %1373 = vsyncadd (!%p1117_p11), %s873_s8, 4294967168  ;;  %s22_s25 = sadd.s32 1, %s1404_s25   ;;  %s1786_s18 = smov %s1380_s19 }
 0x7c8   : > { %p19_p1 = scmp.ge.s32.totalorder %s22_s25, 6   ;;  %s1787_s19 = smov %s1384_s20 }
 0x7c9   : > { %s1788_s20 = smov %s1610_s1  ;;  %s1789_s21 = smov %s1396_s23 }
 0x7ca   : > { %s1790_s22 = smov %s1400_s24  ;;  %s1791_s23 = smov %s1794_s14 }
 0x7cb   : > { %s1792_s24 = smov %s1798_s15  ;;  %21 = sbr.rel (!%p19_p1) target bundleno = 10 (0xa), region = 111 }
 0x7d2   :  { %878 = vsyncpa [#allocation5], 1 }
 0x7d3   :  { %880 = vsyncpa [#allocation5 + $0x1], 1 }
 0x7d4   :  { %881 = vsyncpa [#allocation8], 1 }
 0x7d5   :  { %882 = vsyncpa [#allocation6], 1 }
 0x7d6   :  { %884 = vsyncpa [#allocation6 + $0x1], 1 }

</bundles_post_ra>
